<compile_context>
chip_gen: v5e
topology: v5e:2x2
jax: 0.10.0
libtpu: 0.0.40
codegen_flags: <defaults>
</compile_context>

<pallas_src>
import functools

import jax
import jax.numpy as jnp
from jax.experimental import pallas as pl
from jax.experimental.pallas import tpu as pltpu


def _label_smooth_ce_kernel(x_ref, t_ref, o_ref, acc_ref, *,
                            epsilon, num_classes, total_b, tile_b, has_tail):
    # x_ref: (TB, C) logits tile (any float dtype); t_ref: (TB, 1) int32 labels
    # o_ref: (1, 8, 128) per-split partial-sum block; acc_ref: (1, 1) f32 scratch
    i = pl.program_id(1)                 # step within this split (reduction axis)
    n_steps = pl.num_programs(1)

    @pl.when(i == 0)
    def _():
        acc_ref[...] = jnp.zeros_like(acc_ref)

    x = x_ref[...].astype(jnp.float32)   # cast AFTER the (possibly bf16) load
    t = t_ref[...]                       # (TB, 1) int32
    tb, c = x.shape

    # Numerically stable log-softmax pieces; never materialize log_probs.
    m = jnp.max(x, axis=1, keepdims=True)                               # (TB, 1)
    shifted = x - m
    lse = jnp.log(jnp.sum(jnp.exp(shifted), axis=1, keepdims=True))     # (TB, 1)

    # In-register "gather" of the target-class shifted logit: (1, C) lane iota
    # broadcast against (TB, 1) labels (no (TB, C) iota temporary).
    class_ids = jax.lax.broadcasted_iota(jnp.int32, (1, c), 1)
    tgt_shift = jnp.sum(jnp.where(class_ids == t, shifted, 0.0),
                        axis=1, keepdims=True)                          # (TB, 1)
    row_sum_shift = jnp.sum(shifted, axis=1, keepdims=True)             # (TB, 1)

    # per-row loss = -[(1-eps)*(shifted[t]-lse) + (eps/K)*(sum(shifted)-C*lse)]
    per_row = -((1.0 - epsilon) * (tgt_shift - lse)
                + (epsilon / num_classes) * (row_sum_shift - jnp.float32(c) * lse))

    if has_tail:
        # Statically gated: only pay for the row mask when the last tile is
        # ragged. Padded-row garbage (possibly NaN) is confined to padded rows
        # by the per-row reductions and dropped here by a NaN-safe select.
        s = pl.program_id(0)
        row_ids = (s * n_steps + i) * tile_b + jax.lax.broadcasted_iota(
            jnp.int32, (tb, 1), 0)
        per_row = jnp.where(row_ids < total_b, per_row, 0.0)

    acc_ref[...] += jnp.sum(per_row, keepdims=True)                     # (1, 1)

    @pl.when(i == n_steps - 1)
    def _():
        # Raw per-split partial sum; global sum and /B happen in the wrapper.
        o_ref[...] = jnp.broadcast_to(acc_ref[...], o_ref.shape)


def _vmem_capacity_bytes():
    """Generation-aware per-core VMEM size; conservative fallback (v7x = 64 MiB)."""
    try:
        return int(pltpu.get_tpu_info().vmem_capacity_bytes)
    except Exception:
        return 64 * 1024 * 1024


def _pick_tile_b(b, c, itemsize, vmem_cap):
    """Pick TILE_B purely from a VMEM-bytes budget (no arbitrary row cap).

    Per-step footprint ~= 2 * TB*C*itemsize   (double-buffered logits DMA)
                        + 4 * TB*C*4          (f32 upcast + shifted/exp/select temps)
    """
    budget = int(vmem_cap * 0.45)            # leave headroom for labels/scratch/spill
    per_row = 2 * c * itemsize + 4 * c * 4
    max_rows = max(8, budget // max(1, per_row))
    tb = min(b, max_rows)
    if tb >= b:
        return b                              # full-extent block is always legal
    sub = 8 * max(1, 4 // itemsize)           # sublane packing: f32->8, bf16->16, i8->32
    tb = max(sub, (tb // sub) * sub)
    return min(tb, b)


def cross_entropy_label_smooth(inputs, targets, *, num_classes, epsilon=0.1,
                               tile_b=None):
    """inputs: (B, num_classes) float logits (f32 or bf16); targets: (B,) int labels."""
    b, c = inputs.shape
    assert c == num_classes
    t2d = targets.astype(jnp.int32).reshape(b, 1)

    itemsize = jnp.dtype(inputs.dtype).itemsize
    vmem_cap = _vmem_capacity_bytes()
    if tile_b is None:
        tile_b = _pick_tile_b(b, c, itemsize, vmem_cap)
    tile_b = min(int(tile_b), b)

    n_tiles = pl.cdiv(b, tile_b)
    # Split the batch-tile sweep across TensorCores when the tile count divides
    # evenly (v7x megacore: 2 TCs; on 1-TC chips this is just a serial loop).
    num_splits = 2 if (n_tiles >= 2 and n_tiles % 2 == 0) else 1
    steps = n_tiles // num_splits
    has_tail = (b % tile_b) != 0

    kernel = functools.partial(
        _label_smooth_ce_kernel,
        epsilon=float(epsilon),
        num_classes=int(num_classes),
        total_b=int(b),
        tile_b=int(tile_b),
        has_tail=bool(has_tail),
    )

    out = pl.pallas_call(
        kernel,
        out_shape=jax.ShapeDtypeStruct((num_splits, 8, 128), jnp.float32),
        grid_spec=pltpu.PrefetchScalarGridSpec(
            num_scalar_prefetch=0,
            grid=(num_splits, steps),
            in_specs=[
                pl.BlockSpec((tile_b, c), lambda s, i: (s * steps + i, 0)),  # logits
                pl.BlockSpec((tile_b, 1), lambda s, i: (s * steps + i, 0)),  # labels
            ],
            out_specs=pl.BlockSpec((1, 8, 128), lambda s, i: (s, 0, 0)),     # per-split partial
            scratch_shapes=[pltpu.VMEM((1, 1), jnp.float32)],
        ),
        compiler_params=pltpu.CompilerParams(
            dimension_semantics=("parallel", "arbitrary"),
            vmem_limit_bytes=int(vmem_cap * 0.8),
        ),
        cost_estimate=pl.CostEstimate(
            flops=6 * b * c,
            transcendentals=b * c,
            bytes_accessed=b * c * itemsize + b * 4 + num_splits * 8 * 128 * 4,
        ),
    )(inputs, t2d)

    # Sum per-split partials and divide by the GLOBAL batch size once.
    return jnp.sum(out[:, 0, 0]) / jnp.float32(b)


def _reference(inputs, targets, num_classes, epsilon=0.1):
    # Pure-JAX reference mirroring the PyTorch module's forward.
    log_probs = jax.nn.log_softmax(inputs.astype(jnp.float32), axis=1)
    onehot = jax.nn.one_hot(targets, num_classes, dtype=jnp.float32)
    smooth = (1.0 - epsilon) * onehot + epsilon / num_classes
    return jnp.sum(jnp.mean(-smooth * log_probs, axis=0))


if __name__ == "__main__":
    epsilon = 0.1
    key = jax.random.PRNGKey(0)
    k1, k2, k3, k4, k5, k6 = jax.random.split(key, 6)

    # Case 1: small f32 case matching the module (batch=8, classes=32).
    num_classes = 32
    batch = 8
    inputs = jax.random.normal(k1, (batch, num_classes), dtype=jnp.float32)
    targets = jax.random.randint(k2, (batch,), 0, num_classes, dtype=jnp.int32)
    loss = cross_entropy_label_smooth(inputs, targets,
                                      num_classes=num_classes, epsilon=epsilon)
    jax.block_until_ready(loss)
    ref = _reference(inputs, targets, num_classes, epsilon)
    assert jnp.allclose(loss, ref, rtol=1e-5, atol=1e-5), (loss, ref)

    # Case 2: bf16 logits (no f32 upcast in the wrapper path), non-8-aligned batch.
    num_classes2 = 32
    batch2 = 20
    inputs2 = jax.random.normal(k3, (batch2, num_classes2), dtype=jnp.float32)
    targets2 = jax.random.randint(k4, (batch2,), 0, num_classes2, dtype=jnp.int32)
    loss2 = cross_entropy_label_smooth(inputs2.astype(jnp.bfloat16), targets2,
                                       num_classes=num_classes2, epsilon=epsilon)
    jax.block_until_ready(loss2)
    ref2 = _reference(inputs2.astype(jnp.bfloat16), targets2, num_classes2, epsilon)
    assert jnp.allclose(loss2, ref2, rtol=1e-4, atol=1e-4), (loss2, ref2)

    # Case 3: forced small tile -> exercises the 2-split grid, the accumulator
    # init/finalize per split, and ragged tail masking (60 rows, 8-row tiles).
    num_classes3 = 128
    batch3 = 60
    inputs3 = jax.random.normal(k5, (batch3, num_classes3), dtype=jnp.float32)
    targets3 = jax.random.randint(k6, (batch3,), 0, num_classes3, dtype=jnp.int32)
    loss3 = cross_entropy_label_smooth(inputs3, targets3,
                                       num_classes=num_classes3, epsilon=epsilon,
                                       tile_b=8)
    jax.block_until_ready(loss3)
    ref3 = _reference(inputs3, targets3, num_classes3, epsilon)
    assert jnp.allclose(loss3, ref3, rtol=1e-4, atol=1e-4), (loss3, ref3)

    print("KERNEL_OK")
</pallas_src>

<mosaic_0001>
module attributes {stable_mosaic.version = 11 : i64} {
  func.func @_label_smooth_ce_kernel(%arg0: i32, %arg1: i32, %arg2: memref<8x32xf32, #tpu.memory_space<vmem>>, %arg3: memref<8x1xi32, #tpu.memory_space<vmem>>, %arg4: memref<1x8x128xf32, #tpu.memory_space<vmem>>, %arg5: memref<1x1xf32, #tpu.memory_space<vmem>>) attributes {dimension_semantics = [#tpu.dimension_semantics<parallel>, #tpu.dimension_semantics<arbitrary>], iteration_bounds = array<i64: 1, 1>, scalar_prefetch = 0 : i64, scratch_operands = 1 : i64, tpu.core_type = #tpu.core_type<tc>, window_params = [{transform_indices = @transform_0, window_bounds = array<i64: 8, 32>}, {transform_indices = @transform_1, window_bounds = array<i64: 8, 1>}, {transform_indices = @transform_2, window_bounds = array<i64: 1, 8, 128>}]} {
    %c0_i32 = arith.constant 0 : i32
    %0 = arith.cmpi eq, %arg1, %c0_i32 : i32
    %1 = arith.extui %0 : i1 to i32
    %c0_i32_0 = arith.constant 0 : i32
    %2 = arith.cmpi ne, %1, %c0_i32_0 : i32
    scf.if %2 {
      %cst_19 = arith.constant 0.000000e+00 : f32
      %45 = vector.broadcast %cst_19 : f32 to vector<1x1xf32>
      %c0_20 = arith.constant 0 : index
      %c0_21 = arith.constant 0 : index
      %46 = vector.load %arg5[%c0_20, %c0_21] : memref<1x1xf32, #tpu.memory_space<vmem>>, vector<1x1xf32>
      tpu.vector_store %arg5[%c0_20, %c0_21], %45 {strides = array<i32>} : memref<1x1xf32, #tpu.memory_space<vmem>>, vector<1x1xf32>,
    } else {
    }
    %c0 = arith.constant 0 : index
    %c0_1 = arith.constant 0 : index
    %3 = vector.load %arg2[%c0, %c0_1] : memref<8x32xf32, #tpu.memory_space<vmem>>, vector<8x32xf32>
    %c0_2 = arith.constant 0 : index
    %c0_3 = arith.constant 0 : index
    %4 = vector.load %arg3[%c0_2, %c0_3] : memref<8x1xi32, #tpu.memory_space<vmem>>, vector<8x1xi32>
    %cst = arith.constant dense<0xFF800000> : vector<8xf32>
    %5 = vector.multi_reduction <maximumf>, %3, %cst [1] : vector<8x32xf32> to vector<8xf32>
    %6 = vector.shape_cast %5 : vector<8xf32> to vector<8x1xf32>
    %7 = vector.broadcast %6 : vector<8x1xf32> to vector<8x32xf32>
    %8 = arith.subf %3, %7 : vector<8x32xf32>
    %9 = math.exp %8 : vector<8x32xf32>
    %cst_4 = arith.constant dense<0.000000e+00> : vector<8xf32>
    %10 = vector.multi_reduction <add>, %9, %cst_4 [1] : vector<8x32xf32> to vector<8xf32>
    %11 = vector.shape_cast %10 : vector<8xf32> to vector<8x1xf32>
    %12 = math.log %11 : vector<8x1xf32>
    %13 = tpu.iota {dimensions = array<i32: 1>} : vector<1x32xi32>
    %14 = vector.broadcast %13 : vector<1x32xi32> to vector<8x32xi32>
    %15 = vector.broadcast %4 : vector<8x1xi32> to vector<8x32xi32>
    %16 = arith.cmpi eq, %14, %15 : vector<8x32xi32>
    %cst_5 = arith.constant 0.000000e+00 : f32
    %17 = vector.broadcast %cst_5 : f32 to vector<8x32xf32>
    %18 = arith.select %16, %8, %17 : vector<8x32xi1>, vector<8x32xf32>
    %cst_6 = arith.constant dense<0.000000e+00> : vector<8xf32>
    %19 = vector.multi_reduction <add>, %18, %cst_6 [1] : vector<8x32xf32> to vector<8xf32>
    %20 = vector.shape_cast %19 : vector<8xf32> to vector<8x1xf32>
    %cst_7 = arith.constant dense<0.000000e+00> : vector<8xf32>
    %21 = vector.multi_reduction <add>, %8, %cst_7 [1] : vector<8x32xf32> to vector<8xf32>
    %22 = vector.shape_cast %21 : vector<8xf32> to vector<8x1xf32>
    %23 = arith.subf %20, %12 : vector<8x1xf32>
    %cst_8 = arith.constant 0.899999976 : f32
    %24 = vector.broadcast %cst_8 : f32 to vector<8x1xf32>
    %25 = arith.mulf %24, %23 : vector<8x1xf32>
    %cst_9 = arith.constant 3.200000e+01 : f32
    %26 = vector.broadcast %cst_9 : f32 to vector<8x1xf32>
    %27 = arith.mulf %26, %12 : vector<8x1xf32>
    %28 = arith.subf %22, %27 : vector<8x1xf32>
    %cst_10 = arith.constant 3.125000e-03 : f32
    %29 = vector.broadcast %cst_10 : f32 to vector<8x1xf32>
    %30 = arith.mulf %29, %28 : vector<8x1xf32>
    %31 = arith.addf %25, %30 : vector<8x1xf32>
    %cst_11 = arith.constant 0.000000e+00 : f32
    %32 = vector.broadcast %cst_11 : f32 to vector<8x1xf32>
    %33 = arith.subf %32, %31 : vector<8x1xf32>
    %c0_12 = arith.constant 0 : index
    %c0_13 = arith.constant 0 : index
    %34 = vector.load %arg5[%c0_12, %c0_13] : memref<1x1xf32, #tpu.memory_space<vmem>>, vector<1x1xf32>
    %35 = vector.shape_cast %33 : vector<8x1xf32> to vector<1x8x1xf32>
    %cst_14 = arith.constant dense<0.000000e+00> : vector<1xf32>
    %36 = vector.multi_reduction <add>, %35, %cst_14 [1, 2] : vector<1x8x1xf32> to vector<1xf32>
    %37 = vector.shape_cast %36 : vector<1xf32> to vector<1x1x1xf32>
    %38 = vector.extract %37[0, 0, 0] : f32 from vector<1x1x1xf32>
    %39 = vector.broadcast %38 : f32 to vector<1x1xf32>
    %40 = arith.addf %34, %39 : vector<1x1xf32>
    %c0_15 = arith.constant 0 : index
    %c0_16 = arith.constant 0 : index
    %41 = vector.load %arg5[%c0_15, %c0_16] : memref<1x1xf32, #tpu.memory_space<vmem>>, vector<1x1xf32>
    tpu.vector_store %arg5[%c0_15, %c0_16], %40 {strides = array<i32>} : memref<1x1xf32, #tpu.memory_space<vmem>>, vector<1x1xf32>,
    %c0_i32_17 = arith.constant 0 : i32
    %42 = arith.cmpi eq, %arg1, %c0_i32_17 : i32
    %43 = arith.extui %42 : i1 to i32
    %c0_i32_18 = arith.constant 0 : i32
    %44 = arith.cmpi ne, %43, %c0_i32_18 : i32
    scf.if %44 {
      %c0_19 = arith.constant 0 : index
      %c0_20 = arith.constant 0 : index
      %45 = vector.load %arg5[%c0_19, %c0_20] : memref<1x1xf32, #tpu.memory_space<vmem>>, vector<1x1xf32>
      %46 = vector.shape_cast %45 : vector<1x1xf32> to vector<1x1x1xf32>
      %47 = vector.broadcast %46 : vector<1x1x1xf32> to vector<1x8x128xf32>
      %c0_21 = arith.constant 0 : index
      %c0_22 = arith.constant 0 : index
      %c0_23 = arith.constant 0 : index
      %48 = vector.load %arg4[%c0_21, %c0_22, %c0_23] : memref<1x8x128xf32, #tpu.memory_space<vmem>>, vector<1x8x128xf32>
      tpu.vector_store %arg4[%c0_21, %c0_22, %c0_23], %47 {strides = array<i32>} : memref<1x8x128xf32, #tpu.memory_space<vmem>>, vector<1x8x128xf32>,
    } else {
    }
    return
  }
  func.func @transform_0(%arg0: i32, %arg1: i32) -> (i32, i32) {
    %c1_i32 = arith.constant 1 : i32
    %0 = arith.muli %arg0, %c1_i32 : i32
    %1 = arith.addi %0, %arg1 : i32
    %c0_i32 = arith.constant 0 : i32
    %c0_i32_0 = arith.constant 0 : i32
    return %1, %c0_i32 : i32, i32
  }
  func.func @transform_1(%arg0: i32, %arg1: i32) -> (i32, i32) {
    %c1_i32 = arith.constant 1 : i32
    %0 = arith.muli %arg0, %c1_i32 : i32
    %1 = arith.addi %0, %arg1 : i32
    %c0_i32 = arith.constant 0 : i32
    %c0_i32_0 = arith.constant 0 : i32
    return %1, %c0_i32 : i32, i32
  }
  func.func @transform_2(%arg0: i32, %arg1: i32) -> (i32, i32, i32) {
    %c0_i32 = arith.constant 0 : i32
    %c0_i32_0 = arith.constant 0 : i32
    %c0_i32_1 = arith.constant 0 : i32
    return %arg0, %c0_i32, %c0_i32_0 : i32, i32, i32
  }
}

</mosaic_0001>

<bundles_post_ra>
// kernel: tpu_custom_call.1
= control target key start
LH: loop header
LB: loop body
LE: loop exit
PB: predicated region body
PF: predicated region fallthrough
CT: control target
= control target key end

     0   :  { %vm54_vm0 = vcmask 261120   ;;  %s210_s0 = inlined_call_operand.vmem [shape: f32[8,32], index: 0, kind: input, shape index: {}]   ;;  %s211_s1 = inlined_call_operand.vmem [shape: s32[8,1], index: 1, kind: input, shape index: {}]   ;;  %s212_s2 = inlined_call_operand.hbm [shape: f32[1,8,128], index: 2, kind: output, shape index: {}]  }
   0x1   :  { %v52_v0 = vld [vmem:[%s210_s0] sm:$0xff] }
   0x2   :  { %7 = vsyncpa [#allocation4], 0  ;;  %v55_v1 = vsel %vm54_vm0, %v52_v0, -inf  ;;  %v179_v2 = vmov 0   ;;  %v53_v3 = vld [vmem:[%s211_s1] sm:$0xff]  ;;  %v66_v10 = vlaneseq  ;;  %vm87_vm2 = vcmask 7168  }
   0x3   :  { %146 = vset.pattern.permute.xlu0 %v179_v2  ;;  %147 = vset.pattern.permute.xlu1 %v179_v2  ;;  %vm50_vm3 = vcmask 0   ;;  %v180_v28 = vmov 0.0   ;;  %s181_s1 = smov [#allocation3]   ;;  %s120_s16 = sshll.u32 %s212_s2, 4  ;;  %s121_s16 = int_to_ptr.hbm [resolvable:$true] %s120_s16 }
   0x4   :  { %56 = vmax.xlane.f32.xlu0 %v55_v1  ;;  %v67_v11 = vand.u32 127, %v66_v10  ;;  %51 = vst.msk [vmem:[#allocation2] sm:$0x1] %vm50_vm3, %v180_v28  ;;  %s118_s13 = sshll.u32 %s181_s1, 4  ;;  %s119_s13 = int_to_ptr.vmem [resolvable:$true] %s118_s13 }
   0xb   :  { %v86_v36 = vld [vmem:[#allocation2] sm:$0x1] }
  0x18   :  { %69 = vperm.xlu0 %146, %v53_v3  }
  0x77   :  { %v57_v4 = vpop.xlane.xlu0 %56 }
  0x78   :  { %v58_v5 = vsub.f32 %v52_v0, %v57_v4 }
  0x7a   :  { %v59_v6 = vmul.f32 1.442695, %v58_v5  ;;  %v76_v7 = vsel %vm54_vm0, %v58_v5, 0.0 }
  0x7b   :  { %77 = vadd.xlane.f32.xlu2 %v76_v7 }
  0x7c   :  { %149 = vpow2.f32 %v59_v6 }
  0x82   :  { %v150_v8 = vpop.eup %149 }
  0x83   :  { %v61_v9 = vsel %vm54_vm0, %v150_v8, 0.0 }
  0x84   :  { %62 = vadd.xlane.f32.xlu1 %v61_v9 }
  0x8a   :  { %v70_v12 = vpop.permute.xlu0 %69 }
  0x8b   :  { %vm71_vm1 = vcmp.eq.s32.totalorder %v67_v11, %v70_v12 }
  0x8c   :  { %v72_v13 = vsel %vm71_vm1, %v58_v5, 0.0 }
  0x8d   :  { %v73_v14 = vsel %vm54_vm0, %v72_v13, 0.0 }
  0x8e   :  { %74 = vadd.xlane.f32.xlu1 %v73_v14 }
  0xee   :  { %v78_v20 = vpop.xlane.xlu2 %77 }
  0xf7   :  { %v63_v15 = vpop.xlane.xlu1 %62 }
  0xf8   :  { %151 = vlog2.f32 %v63_v15 }
  0xfe   :  { %v152_v16 = vpop.eup %151 }
  0xff   :  { %v65_v17 = vmul.f32 0.6931472, %v152_v16 }
 0x101   :  { %v81_v18 = vmul.f32 32.0, %v65_v17  ;;  %v75_v19 = vpop.xlane.xlu1 %74 }
 0x102   :  { %v79_v21 = vsub.f32 %v75_v19, %v65_v17 }
 0x103   :  { %v82_v22 = vsub.f32 %v78_v20, %v81_v18 }
 0x104   :  { %v80_v23 = vmul.f32 0.9, %v79_v21 }
 0x105   :  { %v83_v24 = vmul.f32 0.003125, %v82_v22 }
 0x107   :  { %v84_v25 = vadd.f32 %v83_v24, %v80_v23 }
 0x109   :  { %v85_v26 = vsub.f32 0.0, %v84_v25 }
 0x10b   :  { %v88_v27 = vsel %vm87_vm2, %v85_v26, 0.0 }
 0x10c   :  { %89 = vadd.xlane.f32.xlu2 %v88_v27 }
 0x17f   :  { %v90_v29 = vpop.xlane.xlu2 %89 }
 0x180   :  { %v91_v30 = vrot.slane %v90_v29, 4 }
 0x182   :  { %v92_v31 = vadd.f32 %v91_v30, %v90_v29 }
 0x184   :  { %v93_v32 = vrot.slane %v92_v31, 2 }
 0x186   :  { %v94_v33 = vadd.f32 %v93_v32, %v92_v31 }
 0x188   :  { %v95_v34 = vrot.slane %v94_v33, 1 }
 0x18a   :  { %v96_v35 = vadd.f32 %v95_v34, %v94_v33 }
 0x18c   :  { %141 = vpush %v96_v35 }
 0x1bd   :  { %s142_s0 = spop %141 }
 0x1be   :  { %v98_v37 = vstv %s142_s0 }
 0x1bf   :  { %v99_v38 = vadd.f32 %v98_v37, %v86_v36 }
 0x1c1   :  { %101 = vst.msk [vmem:[#allocation2] sm:$0x1] %vm50_vm3, %v99_v38 }
 0x1c8   :  { %v148_v39 = vld [vmem:[#allocation2] ss:$0 sm:$0xff] }
 0x1c9   :  { %109 = vperm.xlu1 %147, %v148_v39  }
 0x23b   :  { %v110_v40 = vpop.permute.xlu1 %109 }
 0x23c   :  { %112 = vst [vmem:[#allocation3] sm:$0xff] %v110_v40 }
 0x23d   :  { %123 = dma.vmem_to_hbm [thread:$0]  %s119_s13, 128, %s121_s16, [#allocation4]  }
 0x23e   :  { %177 = dma.done.wait [#allocation4], 128  }
 0x23f   :  { %178 = vsyncadd [#allocation4], 4294967168 }
 0x240   :  { %128 = vsyncpa [#allocation4], 1 }

</bundles_post_ra>
